<compile_context>
chip_gen: v7x
topology: tpu7x:2x2x1
jax: 0.10.0
libtpu: 0.0.40
codegen_flags: <defaults>
</compile_context>

<pallas_src>
import functools
import math

import jax
import jax.numpy as jnp
from jax import lax
from jax.experimental import pallas as pl
from jax.experimental.pallas import tpu as pltpu

NEG_INF = float(jnp.finfo(jnp.float32).min)   # matches torch masked_fill value


# ------------------------------ tiling helpers ------------------------------ #

def _choose_tile(dim, target, align):
    """Pick a block size for `dim`.

    Returns (tile, padded_dim).  Either tile == dim (single full-extent block,
    always layout-legal), or tile is an `align`-multiple <= target and
    padded_dim is the smallest tile-multiple >= dim.
    """
    if dim <= target:
        return dim, dim
    t = max((target // align) * align, align)
    cand = t
    while cand >= align:
        if dim % cand == 0:
            return cand, dim
        cand -= align
    padded = -(-dim // t) * t
    return t, padded


def _row_tile(rows, target):
    """Row (sublane) tile for an already-padded row count; never re-pads."""
    tile, padded = _choose_tile(rows, target, 8)
    return tile if padded == rows else rows


def _pad_rows(x, rows):
    if x.shape[1] == rows:
        return x
    return jnp.pad(x, ((0, 0), (0, rows - x.shape[1]), (0, 0)))


# ------------------ Linear: full-width, full-depth GEMM --------------------- #
# y[b, t, :] = x[b, t, :] @ w + bias   (w already transposed to (Fin, Fout)).
# Weight and bias blocks use constant index maps -> DMA'd once, resident.

def _linear_kernel(x_ref, w_ref, b_ref, o_ref):
    y = jnp.dot(x_ref[0], w_ref[...], preferred_element_type=jnp.float32)
    o_ref[0] = (y + b_ref[...]).astype(o_ref.dtype)


def linear(x, w, b, *, out_dtype, tm=512):
    B, T, Fin = x.shape
    Fout = w.shape[1]
    tile = _row_tile(T, tm)
    grid = (B, T // tile)
    return pl.pallas_call(
        _linear_kernel,
        out_shape=jax.ShapeDtypeStruct((B, T, Fout), out_dtype),
        grid_spec=pltpu.PrefetchScalarGridSpec(
            num_scalar_prefetch=0,
            grid=grid,
            in_specs=[
                pl.BlockSpec((1, tile, Fin), lambda b, ti: (b, ti, 0)),
                pl.BlockSpec((Fin, Fout), lambda b, ti: (0, 0)),
                pl.BlockSpec((1, Fout), lambda b, ti: (0, 0)),
            ],
            out_specs=pl.BlockSpec((1, tile, Fout), lambda b, ti: (b, ti, 0)),
        ),
        compiler_params=pltpu.CompilerParams(
            dimension_semantics=("parallel", "parallel")),
    )(x, w, b.reshape(1, Fout))


# ------------------- fused Q/K/V projection (single launch) ----------------- #

def _qkv_proj_kernel(xq_ref, xk_ref, xv_ref, w_ref, b_ref, q_ref, k_ref, v_ref):
    for i, (x_ref, o_ref) in enumerate(
            ((xq_ref, q_ref), (xk_ref, k_ref), (xv_ref, v_ref))):
        y = jnp.dot(x_ref[0], w_ref[i], preferred_element_type=jnp.float32)
        o_ref[0] = (y + b_ref[i]).astype(o_ref.dtype)


def fused_qkv_projection(xq, xk, xv, w3, b3, *, tm=512):
    B, T, F = xq.shape
    tile = _row_tile(T, tm)
    grid = (B, T // tile)
    x_spec = pl.BlockSpec((1, tile, F), lambda b, ti: (b, ti, 0))
    o_spec = pl.BlockSpec((1, tile, F), lambda b, ti: (b, ti, 0))
    o_shape = jax.ShapeDtypeStruct((B, T, F), jnp.bfloat16)
    return pl.pallas_call(
        _qkv_proj_kernel,
        out_shape=(o_shape, o_shape, o_shape),
        grid_spec=pltpu.PrefetchScalarGridSpec(
            num_scalar_prefetch=0,
            grid=grid,
            in_specs=[x_spec, x_spec, x_spec,
                      pl.BlockSpec((3, F, F), lambda b, ti: (0, 0, 0)),
                      pl.BlockSpec((3, 1, F), lambda b, ti: (0, 0, 0))],
            out_specs=(o_spec, o_spec, o_spec),
        ),
        compiler_params=pltpu.CompilerParams(
            dimension_semantics=("parallel", "parallel")),
    )(xq, xk, xv, w3, b3)


# ----------------- Flash attention (online softmax, all heads) -------------- #

def _flash_attn_kernel(*refs, n_head, d_k, masked):
    if masked:
        q_ref, k_ref, v_ref, mask_ref, o_ref, m_sc, l_sc, acc_sc = refs
    else:
        q_ref, k_ref, v_ref, o_ref, m_sc, l_sc, acc_sc = refs
        mask_ref = None

    ki = pl.program_id(2)

    @pl.when(ki == 0)
    def _init():
        m_sc[...] = jnp.full_like(m_sc, NEG_INF)
        l_sc[...] = jnp.zeros_like(l_sc)
        acc_sc[...] = jnp.zeros_like(acc_sc)

    q = q_ref[0]                                   # (tq, F) bf16, pre-scaled
    k = k_ref[0]                                   # (tkv, F) bf16
    v = v_ref[0]                                   # (tkv, F) bf16
    keep = (mask_ref[0] > 0) if masked else None   # (tq|1, tkv) bool

    for h in range(n_head):
        lo, hi = h * d_k, (h + 1) * d_k
        s = lax.dot_general(q[:, lo:hi], k[:, lo:hi],
                            (((1,), (1,)), ((), ())),
                            preferred_element_type=jnp.float32)   # (tq, tkv)
        if masked:
            s = jnp.where(keep, s, NEG_INF)
        m_prev = m_sc[h]                                           # (tq, 1)
        m_new = jnp.maximum(m_prev, jnp.max(s, axis=-1, keepdims=True))
        alpha = jnp.exp(m_prev - m_new)
        p = jnp.exp(s - m_new)
        if masked:
            p = jnp.where(keep, p, 0.0)        # torch post-softmax masked_fill
        l_sc[h] = alpha * l_sc[h] + jnp.sum(p, axis=-1, keepdims=True)
        acc_sc[h] = alpha * acc_sc[h] + jnp.dot(
            p.astype(v.dtype), v[:, lo:hi], preferred_element_type=jnp.float32)
        m_sc[h] = m_new

    @pl.when(ki == pl.num_programs(2) - 1)
    def _finalize():
        pieces = []
        for h in range(n_head):
            l = l_sc[h]
            inv = pl.reciprocal(l, approx=True)
            if masked:
                inv = jnp.where(l > 0.0, inv, 0.0)   # fully-masked rows -> 0
            pieces.append(acc_sc[h] * inv)
        # one lane-dense (tq, F) store in the packed head layout
        o_ref[0] = jnp.concatenate(pieces, axis=-1).astype(o_ref.dtype)


def flash_attention(q, k, v, mask_i8, *, n_head, tq, tkv):
    B, T1p, F = q.shape
    T2p = k.shape[1]
    d_k = F // n_head
    grid = (B, T1p // tq, T2p // tkv)
    masked = mask_i8 is not None

    in_specs = [
        pl.BlockSpec((1, tq, F), lambda b, qi, ki: (b, qi, 0)),
        pl.BlockSpec((1, tkv, F), lambda b, qi, ki: (b, ki, 0)),
        pl.BlockSpec((1, tkv, F), lambda b, qi, ki: (b, ki, 0)),
    ]
    args = [q, k, v]
    if masked:
        has_b = mask_i8.shape[0] != 1
        has_t1 = mask_i8.shape[1] != 1
        mq = tq if has_t1 else 1

        def mask_map(b, qi, ki, _hb=has_b, _ht=has_t1):
            return (b if _hb else 0, qi if _ht else 0, ki)

        in_specs.append(pl.BlockSpec((1, mq, tkv), mask_map))
        args.append(mask_i8)

    kernel = functools.partial(_flash_attn_kernel,
                               n_head=n_head, d_k=d_k, masked=masked)
    return pl.pallas_call(
        kernel,
        out_shape=jax.ShapeDtypeStruct((B, T1p, F), jnp.bfloat16),
        grid_spec=pltpu.PrefetchScalarGridSpec(
            num_scalar_prefetch=0,
            grid=grid,
            in_specs=in_specs,
            out_specs=pl.BlockSpec((1, tq, F), lambda b, qi, ki: (b, qi, 0)),
            scratch_shapes=[
                pltpu.VMEM((n_head, tq, 1), jnp.float32),     # running max
                pltpu.VMEM((n_head, tq, 1), jnp.float32),     # running denom
                pltpu.VMEM((n_head, tq, d_k), jnp.float32),   # output accum
            ]),
        compiler_params=pltpu.CompilerParams(
            dimension_semantics=("parallel", "parallel", "arbitrary")),
    )(*args)


# -------------------------------- full forward ------------------------------ #

def multi_headed_attention_forward(query, key, value, mask, params, n_head,
                                   *, tq=256, tkv=512, tm=512):
    """Mirrors MultiHeadedAttention.forward (eval mode)."""
    B, T1, F = query.shape
    T2 = key.shape[1]
    assert F % n_head == 0
    d_k = F // n_head
    scale = 1.0 / math.sqrt(d_k)
    f32, bf16 = jnp.float32, jnp.bfloat16

    # Lane-safe tiles + (possibly) padded sequence lengths.  tkv is a lane dim
    # (of the mask block), so it is a multiple of 128 or the full extent.
    tq_, T1p = _choose_tile(T1, tq, 8)
    tkv_, T2p = _choose_tile(T2, tkv, 128)

    # One-time host-side weight prep: torch Linear y = x @ W.T + b, cast to
    # bf16 for the MXU; 1/sqrt(d_k) folded into the Q projection.
    wq = (params["wq"].astype(f32).T * scale).astype(bf16)
    wk = params["wk"].astype(f32).T.astype(bf16)
    wv = params["wv"].astype(f32).T.astype(bf16)
    wo = params["wo"].astype(f32).T.astype(bf16)
    bq = params["bq"].astype(f32) * scale
    bk = params["bk"].astype(f32)
    bv = params["bv"].astype(f32)
    bo = params["bo"].astype(f32)

    xq = _pad_rows(query.astype(bf16), T1p)
    xk = _pad_rows(key.astype(bf16), T2p)
    xv = _pad_rows(value.astype(bf16), T2p)

    if T1p == T2p:
        w3 = jnp.stack([wq, wk, wv])                      # (3, F, F) bf16
        b3 = jnp.stack([bq, bk, bv]).reshape(3, 1, F)     # (3, 1, F) f32
        q, k, v = fused_qkv_projection(xq, xk, xv, w3, b3, tm=tm)
    else:
        q = linear(xq, wq, bq, out_dtype=bf16, tm=tm)
        k = linear(xk, wk, bk, out_dtype=bf16, tm=tm)
        v = linear(xv, wv, bv, out_dtype=bf16, tm=tm)

    # int8 "keep" mask (nonzero = attend); padded key columns are masked.
    mask_i8 = None
    if mask is not None:
        m = (mask != 0).astype(jnp.int8)                  # (B, T1 or 1, T2)
        pad_t1 = (T1p - m.shape[1]) if m.shape[1] != 1 else 0
        mask_i8 = jnp.pad(m, ((0, 0), (0, pad_t1), (0, T2p - T2)))
    elif T2p > T2:
        mask_i8 = (jnp.arange(T2p) < T2).astype(jnp.int8).reshape(1, 1, T2p)

    x_att = flash_attention(q, k, v, mask_i8, n_head=n_head, tq=tq_, tkv=tkv_)

    # TODO(synk): dropout on the attention weights is an eval-mode identity
    # (no in-kernel RNG); the full attention matrix (self.attn) is never
    # materialized (flash-style online softmax).
    out = linear(x_att, wo, bo, out_dtype=f32, tm=tm)
    return out[:, :T1, :]


# ----------------------------- pure-JAX reference --------------------------- #

def reference_forward(query, key, value, mask, params, n_head):
    B, T1, F = query.shape
    T2 = key.shape[1]
    H = n_head
    d_k = F // H

    def lin(x, w, b):
        return x @ w.T + b

    q = lin(query, params["wq"], params["bq"]).reshape(B, T1, H, d_k).transpose(0, 2, 1, 3)
    k = lin(key, params["wk"], params["bk"]).reshape(B, T2, H, d_k).transpose(0, 2, 1, 3)
    v = lin(value, params["wv"], params["bv"]).reshape(B, T2, H, d_k).transpose(0, 2, 1, 3)
    scores = jnp.einsum("bhqd,bhkd->bhqk", q, k) / math.sqrt(d_k)
    if mask is not None:
        m = mask[:, None, :, :] == 0
        scores = jnp.where(m, NEG_INF, scores)
        attn = jax.nn.softmax(scores, axis=-1)
        attn = jnp.where(m, 0.0, attn)
    else:
        attn = jax.nn.softmax(scores, axis=-1)
    x = jnp.einsum("bhqk,bhkd->bhqd", attn, v)
    x = x.transpose(0, 2, 1, 3).reshape(B, T1, F)
    return lin(x, params["wo"], params["bo"])


# ------------------------------------ main ---------------------------------- #

if __name__ == "__main__":
    # -------- Test 1: small shapes, fused QKV path, full-extent tiles -------- #
    B, T, n_head, n_feat = 2, 8, 4, 32
    root = jax.random.PRNGKey(0)
    ks = jax.random.split(root, 12)
    params = {
        "wq": 0.1 * jax.random.normal(ks[0], (n_feat, n_feat), jnp.float32),
        "bq": 0.1 * jax.random.normal(ks[1], (n_feat,), jnp.float32),
        "wk": 0.1 * jax.random.normal(ks[2], (n_feat, n_feat), jnp.float32),
        "bk": 0.1 * jax.random.normal(ks[3], (n_feat,), jnp.float32),
        "wv": 0.1 * jax.random.normal(ks[4], (n_feat, n_feat), jnp.float32),
        "bv": 0.1 * jax.random.normal(ks[5], (n_feat,), jnp.float32),
        "wo": 0.1 * jax.random.normal(ks[6], (n_feat, n_feat), jnp.float32),
        "bo": 0.1 * jax.random.normal(ks[7], (n_feat,), jnp.float32),
    }
    query = jax.random.normal(ks[8], (B, T, n_feat), jnp.float32)
    key_in = jax.random.normal(ks[9], (B, T, n_feat), jnp.float32)
    value = jax.random.normal(ks[10], (B, T, n_feat), jnp.float32)

    # mask: (B, time1, time2); True/1 = attend.  Include a fully-masked query
    # row to exercise the torch post-softmax zeroing semantics.
    mask = jax.random.uniform(ks[11], (B, T, T)) > 0.3
    mask = mask.at[0, 0, :].set(False)
    mask = mask.at[1, :, 0].set(True)

    out = jax.block_until_ready(
        multi_headed_attention_forward(query, key_in, value, mask, params, n_head))
    ref = reference_forward(query, key_in, value, mask, params, n_head)
    assert out.shape == (B, T, n_feat), out.shape
    assert bool(jnp.allclose(out, ref, atol=2e-2, rtol=2e-2)), "mismatch (masked)"

    out2 = jax.block_until_ready(
        multi_headed_attention_forward(query, key_in, value, None, params, n_head))
    ref2 = reference_forward(query, key_in, value, None, params, n_head)
    assert bool(jnp.allclose(out2, ref2, atol=2e-2, rtol=2e-2)), "mismatch (no mask)"

    # -- Test 2: cross-attention shapes exercising multi-tile grids, host-side
    #    T2 padding, the (B, 1, T2) padding-mask form and the non-fused path.
    B2, T1b, T2b, H2, F2 = 2, 320, 192, 4, 64
    ks2 = jax.random.split(jax.random.PRNGKey(1), 12)
    params2 = {
        "wq": 0.1 * jax.random.normal(ks2[0], (F2, F2), jnp.float32),
        "bq": 0.1 * jax.random.normal(ks2[1], (F2,), jnp.float32),
        "wk": 0.1 * jax.random.normal(ks2[2], (F2, F2), jnp.float32),
        "bk": 0.1 * jax.random.normal(ks2[3], (F2,), jnp.float32),
        "wv": 0.1 * jax.random.normal(ks2[4], (F2, F2), jnp.float32),
        "bv": 0.1 * jax.random.normal(ks2[5], (F2,), jnp.float32),
        "wo": 0.1 * jax.random.normal(ks2[6], (F2, F2), jnp.float32),
        "bo": 0.1 * jax.random.normal(ks2[7], (F2,), jnp.float32),
    }
    qb = jax.random.normal(ks2[8], (B2, T1b, F2), jnp.float32)
    kb = jax.random.normal(ks2[9], (B2, T2b, F2), jnp.float32)
    vb = jax.random.normal(ks2[10], (B2, T2b, F2), jnp.float32)
    lengths = jnp.array([150, 192])
    maskb = jnp.arange(T2b)[None, None, :] < lengths[:, None, None]   # (B,1,T2)

    out3 = jax.block_until_ready(
        multi_headed_attention_forward(qb, kb, vb, maskb, params2, H2,
                                       tq=128, tkv=128, tm=128))
    ref3 = reference_forward(qb, kb, vb, maskb, params2, H2)
    assert out3.shape == (B2, T1b, F2), out3.shape
    assert bool(jnp.allclose(out3, ref3, atol=2e-2, rtol=2e-2)), "mismatch (padded/tiled)"

    print("KERNEL_OK")
</pallas_src>

<mosaic_0001>
module attributes {stable_mosaic.version = 11 : i64} {
  func.func @_qkv_proj_kernel(%arg0: i32, %arg1: i32, %arg2: memref<1x8x32xbf16, #tpu.memory_space<vmem>>, %arg3: memref<1x8x32xbf16, #tpu.memory_space<vmem>>, %arg4: memref<1x8x32xbf16, #tpu.memory_space<vmem>>, %arg5: memref<3x32x32xbf16, #tpu.memory_space<vmem>>, %arg6: memref<3x1x32xf32, #tpu.memory_space<vmem>>, %arg7: memref<1x8x32xbf16, #tpu.memory_space<vmem>>, %arg8: memref<1x8x32xbf16, #tpu.memory_space<vmem>>, %arg9: memref<1x8x32xbf16, #tpu.memory_space<vmem>>) attributes {dimension_semantics = [#tpu.dimension_semantics<parallel>, #tpu.dimension_semantics<parallel>], iteration_bounds = array<i64: 2, 1>, scalar_prefetch = 0 : i64, scratch_operands = 0 : i64, tpu.core_type = #tpu.core_type<tc>, window_params = [{transform_indices = @transform_0, window_bounds = array<i64: 1, 8, 32>}, {transform_indices = @transform_1, window_bounds = array<i64: 1, 8, 32>}, {transform_indices = @transform_2, window_bounds = array<i64: 1, 8, 32>}, {pipeline_mode = #tpu.pipeline_mode<synchronous>, transform_indices = @transform_3, window_bounds = array<i64: 3, 32, 32>}, {pipeline_mode = #tpu.pipeline_mode<synchronous>, transform_indices = @transform_4, window_bounds = array<i64: 3, 1, 32>}, {transform_indices = @transform_5, window_bounds = array<i64: 1, 8, 32>}, {transform_indices = @transform_6, window_bounds = array<i64: 1, 8, 32>}, {transform_indices = @transform_7, window_bounds = array<i64: 1, 8, 32>}]} {
    %c0 = arith.constant 0 : index
    %c0_0 = arith.constant 0 : index
    %c0_1 = arith.constant 0 : index
    %0 = vector.load %arg2[%c0, %c0_0, %c0_1] : memref<1x8x32xbf16, #tpu.memory_space<vmem>>, vector<1x8x32xbf16>
    %1 = vector.shape_cast %0 : vector<1x8x32xbf16> to vector<8x32xbf16>
    %c0_2 = arith.constant 0 : index
    %c0_3 = arith.constant 0 : index
    %c0_4 = arith.constant 0 : index
    %2 = vector.load %arg5[%c0_2, %c0_3, %c0_4] : memref<3x32x32xbf16, #tpu.memory_space<vmem>>, vector<1x32x32xbf16>
    %3 = vector.shape_cast %2 : vector<1x32x32xbf16> to vector<32x32xbf16>
    %cst = arith.constant dense<0.000000e+00> : vector<8x32xf32>
    %4 = tpu.matmul %1, %3, %cst {dimension_numbers = #tpu.dot_dimension_numbers<[1], [0], [0], [1], [0, 0, 1, 1], [], []>} : vector<8x32xbf16>, vector<32x32xbf16>, vector<8x32xf32> -> vector<8x32xf32>
    %c0_5 = arith.constant 0 : index
    %c0_6 = arith.constant 0 : index
    %c0_7 = arith.constant 0 : index
    %5 = vector.load %arg6[%c0_5, %c0_6, %c0_7] : memref<3x1x32xf32, #tpu.memory_space<vmem>>, vector<1x1x32xf32>
    %6 = vector.shape_cast %5 : vector<1x1x32xf32> to vector<1x32xf32>
    %7 = vector.broadcast %6 : vector<1x32xf32> to vector<8x32xf32>
    %8 = arith.addf %4, %7 : vector<8x32xf32>
    %9 = arith.truncf %8 : vector<8x32xf32> to vector<8x32xbf16>
    %c0_8 = arith.constant 0 : index
    %c0_9 = arith.constant 0 : index
    %c0_10 = arith.constant 0 : index
    %10 = vector.load %arg7[%c0_8, %c0_9, %c0_10] : memref<1x8x32xbf16, #tpu.memory_space<vmem>>, vector<1x8x32xbf16>
    %11 = vector.shape_cast %10 : vector<1x8x32xbf16> to vector<8x32xbf16>
    %12 = vector.shape_cast %9 : vector<8x32xbf16> to vector<1x8x32xbf16>
    tpu.vector_store %arg7[%c0_8, %c0_9, %c0_10], %12 {strides = array<i32>} : memref<1x8x32xbf16, #tpu.memory_space<vmem>>, vector<1x8x32xbf16>,
    %c0_11 = arith.constant 0 : index
    %c0_12 = arith.constant 0 : index
    %c0_13 = arith.constant 0 : index
    %13 = vector.load %arg3[%c0_11, %c0_12, %c0_13] : memref<1x8x32xbf16, #tpu.memory_space<vmem>>, vector<1x8x32xbf16>
    %14 = vector.shape_cast %13 : vector<1x8x32xbf16> to vector<8x32xbf16>
    %c1 = arith.constant 1 : index
    %c0_14 = arith.constant 0 : index
    %c0_15 = arith.constant 0 : index
    %15 = vector.load %arg5[%c1, %c0_14, %c0_15] : memref<3x32x32xbf16, #tpu.memory_space<vmem>>, vector<1x32x32xbf16>
    %16 = vector.shape_cast %15 : vector<1x32x32xbf16> to vector<32x32xbf16>
    %cst_16 = arith.constant dense<0.000000e+00> : vector<8x32xf32>
    %17 = tpu.matmul %14, %16, %cst_16 {dimension_numbers = #tpu.dot_dimension_numbers<[1], [0], [0], [1], [0, 0, 1, 1], [], []>} : vector<8x32xbf16>, vector<32x32xbf16>, vector<8x32xf32> -> vector<8x32xf32>
    %c1_17 = arith.constant 1 : index
    %c0_18 = arith.constant 0 : index
    %c0_19 = arith.constant 0 : index
    %18 = vector.load %arg6[%c1_17, %c0_18, %c0_19] : memref<3x1x32xf32, #tpu.memory_space<vmem>>, vector<1x1x32xf32>
    %19 = vector.shape_cast %18 : vector<1x1x32xf32> to vector<1x32xf32>
    %20 = vector.broadcast %19 : vector<1x32xf32> to vector<8x32xf32>
    %21 = arith.addf %17, %20 : vector<8x32xf32>
    %22 = arith.truncf %21 : vector<8x32xf32> to vector<8x32xbf16>
    %c0_20 = arith.constant 0 : index
    %c0_21 = arith.constant 0 : index
    %c0_22 = arith.constant 0 : index
    %23 = vector.load %arg8[%c0_20, %c0_21, %c0_22] : memref<1x8x32xbf16, #tpu.memory_space<vmem>>, vector<1x8x32xbf16>
    %24 = vector.shape_cast %23 : vector<1x8x32xbf16> to vector<8x32xbf16>
    %25 = vector.shape_cast %22 : vector<8x32xbf16> to vector<1x8x32xbf16>
    tpu.vector_store %arg8[%c0_20, %c0_21, %c0_22], %25 {strides = array<i32>} : memref<1x8x32xbf16, #tpu.memory_space<vmem>>, vector<1x8x32xbf16>,
    %c0_23 = arith.constant 0 : index
    %c0_24 = arith.constant 0 : index
    %c0_25 = arith.constant 0 : index
    %26 = vector.load %arg4[%c0_23, %c0_24, %c0_25] : memref<1x8x32xbf16, #tpu.memory_space<vmem>>, vector<1x8x32xbf16>
    %27 = vector.shape_cast %26 : vector<1x8x32xbf16> to vector<8x32xbf16>
    %c2 = arith.constant 2 : index
    %c0_26 = arith.constant 0 : index
    %c0_27 = arith.constant 0 : index
    %28 = vector.load %arg5[%c2, %c0_26, %c0_27] : memref<3x32x32xbf16, #tpu.memory_space<vmem>>, vector<1x32x32xbf16>
    %29 = vector.shape_cast %28 : vector<1x32x32xbf16> to vector<32x32xbf16>
    %cst_28 = arith.constant dense<0.000000e+00> : vector<8x32xf32>
    %30 = tpu.matmul %27, %29, %cst_28 {dimension_numbers = #tpu.dot_dimension_numbers<[1], [0], [0], [1], [0, 0, 1, 1], [], []>} : vector<8x32xbf16>, vector<32x32xbf16>, vector<8x32xf32> -> vector<8x32xf32>
    %c2_29 = arith.constant 2 : index
    %c0_30 = arith.constant 0 : index
    %c0_31 = arith.constant 0 : index
    %31 = vector.load %arg6[%c2_29, %c0_30, %c0_31] : memref<3x1x32xf32, #tpu.memory_space<vmem>>, vector<1x1x32xf32>
    %32 = vector.shape_cast %31 : vector<1x1x32xf32> to vector<1x32xf32>
    %33 = vector.broadcast %32 : vector<1x32xf32> to vector<8x32xf32>
    %34 = arith.addf %30, %33 : vector<8x32xf32>
    %35 = arith.truncf %34 : vector<8x32xf32> to vector<8x32xbf16>
    %c0_32 = arith.constant 0 : index
    %c0_33 = arith.constant 0 : index
    %c0_34 = arith.constant 0 : index
    %36 = vector.load %arg9[%c0_32, %c0_33, %c0_34] : memref<1x8x32xbf16, #tpu.memory_space<vmem>>, vector<1x8x32xbf16>
    %37 = vector.shape_cast %36 : vector<1x8x32xbf16> to vector<8x32xbf16>
    %38 = vector.shape_cast %35 : vector<8x32xbf16> to vector<1x8x32xbf16>
    tpu.vector_store %arg9[%c0_32, %c0_33, %c0_34], %38 {strides = array<i32>} : memref<1x8x32xbf16, #tpu.memory_space<vmem>>, vector<1x8x32xbf16>,
    return
  }
  func.func @transform_0(%arg0: i32, %arg1: i32) -> (i32, i32, i32) {
    %c0_i32 = arith.constant 0 : i32
    %c0_i32_0 = arith.constant 0 : i32
    return %arg0, %arg1, %c0_i32 : i32, i32, i32
  }
  func.func @transform_1(%arg0: i32, %arg1: i32) -> (i32, i32, i32) {
    %c0_i32 = arith.constant 0 : i32
    %c0_i32_0 = arith.constant 0 : i32
    return %arg0, %arg1, %c0_i32 : i32, i32, i32
  }
  func.func @transform_2(%arg0: i32, %arg1: i32) -> (i32, i32, i32) {
    %c0_i32 = arith.constant 0 : i32
    %c0_i32_0 = arith.constant 0 : i32
    return %arg0, %arg1, %c0_i32 : i32, i32, i32
  }
  func.func @transform_3(%arg0: i32, %arg1: i32) -> (i32, i32, i32) {
    %c0_i32 = arith.constant 0 : i32
    %c0_i32_0 = arith.constant 0 : i32
    %c0_i32_1 = arith.constant 0 : i32
    %c0_i32_2 = arith.constant 0 : i32
    return %c0_i32, %c0_i32_0, %c0_i32_1 : i32, i32, i32
  }
  func.func @transform_4(%arg0: i32, %arg1: i32) -> (i32, i32, i32) {
    %c0_i32 = arith.constant 0 : i32
    %c0_i32_0 = arith.constant 0 : i32
    %c0_i32_1 = arith.constant 0 : i32
    %c0_i32_2 = arith.constant 0 : i32
    return %c0_i32, %c0_i32_0, %c0_i32_1 : i32, i32, i32
  }
  func.func @transform_5(%arg0: i32, %arg1: i32) -> (i32, i32, i32) {
    %c0_i32 = arith.constant 0 : i32
    %c0_i32_0 = arith.constant 0 : i32
    return %arg0, %arg1, %c0_i32 : i32, i32, i32
  }
  func.func @transform_6(%arg0: i32, %arg1: i32) -> (i32, i32, i32) {
    %c0_i32 = arith.constant 0 : i32
    %c0_i32_0 = arith.constant 0 : i32
    return %arg0, %arg1, %c0_i32 : i32, i32, i32
  }
  func.func @transform_7(%arg0: i32, %arg1: i32) -> (i32, i32, i32) {
    %c0_i32 = arith.constant 0 : i32
    %c0_i32_0 = arith.constant 0 : i32
    return %arg0, %arg1, %c0_i32 : i32, i32, i32
  }
}

</mosaic_0001>

<bundles_post_ra>
// kernel: tpu_custom_call.1
= control target key start
LH: loop header
LB: loop body
LE: loop exit
PB: predicated region body
PF: predicated region fallthrough
CT: control target
= control target key end

     0   :  { %s1782_s0 = inlined_call_operand.hbm [shape: bf16[2,8,32], index: 0, kind: input, shape index: {}]   ;;  %s1783_s1 = inlined_call_operand.hbm [shape: bf16[2,8,32], index: 1, kind: input, shape index: {}]   ;;  %s1784_s2 = inlined_call_operand.hbm [shape: bf16[2,8,32], index: 2, kind: input, shape index: {}]   ;;  %s1785_s3 = inlined_call_operand.hbm [shape: bf16[3,32,32], index: 3, kind: input, shape index: {}]   ;;  %s1786_s4 = inlined_call_operand.vmem [shape: f32[3,1,32], index: 4, kind: input, shape index: {}]   ;;  %s1787_s5 = inlined_call_operand.hbm [shape: bf16[2,8,32], index: 5, kind: output, shape index: {0}]   ;;  %s1788_s6 = inlined_call_operand.hbm [shape: bf16[2,8,32], index: 6, kind: output, shape index: {1}]   ;;  %s1789_s7 = inlined_call_operand.hbm [shape: bf16[2,8,32], index: 7, kind: output, shape index: {2}]  }
   0x1   :  { %1812 = sst [smem:[#allocation26_spill]] %s1783_s1 }
   0x2   :  { %1813 = sst [smem:[#allocation27_spill]] %s1787_s5 }
   0x3   :  { %1814 = sst [smem:[#allocation28_spill]] %s1788_s6 }
   0x4   :  { %1815 = sst [smem:[#allocation29_spill]] %s1789_s7 }
   0x5   :  { %13 = vsyncpa [#allocation3], 0 }
   0x6   :  { %15 = vsyncpa [#allocation3 + $0x1], 0 }
   0x7   :  { %16 = vsyncpa [#allocation6], 0 }
   0x8   :  { %18 = vsyncpa [#allocation6 + $0x1], 0 }
   0x9   :  { %19 = vsyncpa [#allocation9], 0 }
   0xa   :  { %20 = vsyncpa [#allocation4], 0 }
   0xb   :  { %22 = vsyncpa [#allocation4 + $0x1], 0 }
   0xc   :  { %23 = vsyncpa [#allocation12], 0 }
   0xd   :  { %25 = vsyncpa [#allocation12 + $0x1], 0  ;;  %s1388_s24 = smov 0   ;;  %s1390_s25 = smov 0  }
   0xe   :  { %s1392_s26 = smov 0   ;;  %s1394_s27 = smov 0  }
   0xf   :  { %s1396_s28 = smov 0   ;;  %s1398_s29 = smov 0  }
  0x10 LB: > { %1816 = sst [smem:[#allocation19_spill]] %s1315_s24  ;;  %s43_s30 = sadd.s32 1, %s1331_s28  ;;  %s1335_s29 = sphi %s1398_s29, %s31_s29   ;;  %s1331_s28 = sphi %s1396_s28, %s1857_s28   ;;  %s1327_s27 = sphi %s1394_s27, %s1852_s27   ;;  %s1323_s26 = sphi %s1392_s26, %s1856_s26   ;;  %s1319_s25 = sphi %s1390_s25, %s1855_s25   ;;  %s1315_s24 = sphi %s1388_s24, %s1854_s24  }
  0x11   : > { %1817 = sst [smem:[#allocation20_spill]] %s1331_s28  ;;  %s52_s8 = sadd.s32 1, %s1323_s26 }
  0x12   : > { %1818 = sst [smem:[#allocation21_spill]] %s1335_s29  ;;  %p45_p0 = scmp.ge.s32.totalorder %s43_s30, 2 }
  0x13   : > { %p1790_p1 = scmp.ne.s32.totalorder %s1323_s26, %s1319_s25  ;;  %p60_p2 = scmp.eq.s32.totalorder %s1335_s29, 0 }
  0x14   : > { %s1859_s30 = smov (%p45_p0, %s43_s30), 0  ;;  %p1005_p5 = scmp.lt.s32.totalorder %s1335_s29, 2 }
  0x15   : > { %1819 = sst [smem:[#allocation22_spill]] %s1859_s30  ;;  %p61_p4 = por %p60_p2, %p1790_p1 }
  0x16   : > { %s47_s9 = ssub.s32 %s1331_s28, %s1859_s30  ;;  %s1792_s10 = sand.u32 1, %s1323_s26  }
  0x17   : > { %p50_p6 = scmp.eq.s32.totalorder %s47_s9, 0  ;;  %s1435_s11 = sshll.u32 %s1792_s10, 2 }
  0x18   : > { %s1438_s12 = sshll.u32 %s1331_s28, 6  ;;  %p1440_p7 = pnand %p1005_p5, %p61_p4 }
  0x19   : > { %s1445_s14 = scalar_select %p50_p6, %s1323_s26, %s52_s8  }
  0x1a   : > { %s1820_s13 = scalar_select %p1440_p7, 1, 0 }
  0x1b   : > { %1821 = sst [smem:[#allocation23_spill]] %s1445_s14  ;;  %s306_s15 = sand.u32 1, %s1335_s29  }
  0x1c   : > { %s1822_s1 = sld [smem:[#allocation26_spill]]  ;;  %s310_s19 = scalar_lea.vmem [#allocation5], %s1435_s11 }
  0x1d   : > { %s318_s20 = sshll.u32 %s310_s19, 4  ;;  %s1457_s21 = scalar_lea.sflag [#allocation6], %s306_s15  ;;  %s1455_s20 = int_to_ptr.vmem [resolvable:$true] %s318_s20 }
  0x1e   : > { %p1463_p9 = pneg %p1440_p7 }
  0x20   : > { %s1823_s23 = scalar_select %p1463_p9, 1, 0 }
  0x22   : > { %s1452_s18 = scalar_lea.hbm %s1822_s1, %s1438_s12  ;;  %s1072_s16 = scalar_lea.hbm %s1822_s1, 128 }
  0x23   : > { %s1067_s22 = scalar_lea.hbm %s1452_s18, 64  ;;  %p1073_p12 = scmp.lt.u32.totalorder %s1452_s18, %s1822_s1 }
  0x24   : > { %p1068_p8 = scmp.ne.s32.totalorder %s1452_s18, %s1067_s22  ;;  %p1074_p13 = scmp.lt.u32.totalorder %s1072_s16, %s1067_s22 }
  0x25   : > { %p1076_p2 = scmp.lt.u32.totalorder %s1067_s22, %s1452_s18 }
  0x26   : > { %p1070_p10 = pnand %p1463_p9, %p1068_p8  ;;  %p1075_p0 = por %p1074_p13, %p1073_p12 }
  0x28   : > { %p1071_p11 = pneg %p1070_p10  ;;  %p1077_p4 = por %p1076_p2, %p1075_p0 }
  0x2a   : > { %p1078_p5 = pnand %p1077_p4, %p1071_p11 }
  0x2c   : > { %1081 = shalt.err (!%p1078_p5)
}
  0x2d   : > { %s1082_s15 = scalar_lea.vmem %s1455_s20, 64  ;;  %s1337_s8 = smov [#allocation5]  }
  0x2e   : > { %p1083_p6 = scmp.ne.s32.totalorder %s1455_s20, %s1082_s15  ;;  %s1087_s9 = sshll.u32 %s1337_s8, 4  ;;  %s1088_s9 = int_to_ptr.vmem [resolvable:$false] %s1087_s9 }
  0x2f   : > { %s1089_s17 = scalar_lea.vmem %s1088_s9, 128  ;;  %p1090_p3 = scmp.lt.s32.totalorder %s1455_s20, %s1088_s9 }
  0x30   : > { %p1085_p8 = pnand %p1083_p6, %p1463_p9  ;;  %p1091_p1 = scmp.lt.s32.totalorder %s1089_s17, %s1082_s15 }
  0x32   : > { %p1086_p10 = pneg %p1085_p8  ;;  %p1092_p12 = por %p1091_p1, %p1090_p3 }
  0x34   : > { %p1093_p13 = pnand %p1092_p12, %p1086_p10 }
  0x36   : > { %1096 = shalt.err (!%p1093_p13)
}
  0x37   : > { %990 = dma.hbm_to_vmem [thread:$0]  (!%p1440_p7), %s1452_s18, 64, %s1455_s20, %s1457_s21  }
  0x38   : > { %s1488_s22 = sadd.s32 4294967295, %s1335_s29   ;;  %s1791_s16 = sadd.s32 4294967294, %s1335_s29  }
  0x39   : > { %p65_p1 = scmp.ne.s32.totalorder %s1319_s25, %s1315_s24  ;;  %p1799_p3 = scmp.eq.s32.totalorder %s1488_s22, 0 }
  0x3a   : > { %p189_p11 = scmp.eq.s32.totalorder %s1488_s22, 1  ;;  %p195_p0 = scmp.eq.s32.totalorder %s1791_s16, 1 }
  0x3b   : > { %p892_p2 = scmp.ge.s32.totalorder %s1335_s29, 1  ;;  %p1500_p4 = por %p1799_p3, %p65_p1 }
  0x3c   : > { %p1825_p5 = scmp.ne.s32.totalorder %s1323_s26, %s1319_s25  ;;  %p1511_p8 = por %p195_p0, %p65_p1 }
  0x3d   : > { %s1824_s19 = scalar_select %p1500_p4, 1, 0 }
  0x3e   : > { %p1507_p6 = por %p189_p11, %p1825_p5  ;;  %p258_p10 = scmp.lt.s32.totalorder %s1335_s29, 3 }
  0x3f   : > { %s1828_s20 = scalar_select %p1511_p8, 1, 0 }
  0x40   : > { %s1826_s18 = scalar_select %p1507_p6, 1, 0 }
  0x41   : > { %1829 = sst [smem:[#allocation25_spill]] %s1828_s20  ;;  %p1516_p12 = pnand %p892_p2, %p258_p10 }
  0x42   : > { %1827 = sst [smem:[#allocation24_spill]] %s1826_s18  ;;  %s1338_s8 = smov [#allocation8]  }
  0x43   : > { %s1830_s15 = scalar_select %p1516_p12, 1, 0 }
  0x44   : > { %s270_s9 = sshll.u32 %s1338_s8, 4  ;;  %p980_p13 = pneg %p1516_p12  ;;  %s1520_s9 = int_to_ptr.vmem [resolvable:$true] %s270_s9 }
  0x45   : > { %s1534_s1 = scalar_lea.hbm %s1782_s0, %s1438_s12  ;;  %s291_s30 = scalar_lea.vmem [#allocation2], %s1435_s11 }
  0x46   : > { %p1526_p11 = pnand %p980_p13, %p1799_p3  ;;  %s299_s28 = sshll.u32 %s291_s30, 4  ;;  %s1537_s28 = int_to_ptr.vmem [resolvable:$true] %s299_s28 }
  0x47   : > { %s1097_s29 = scalar_lea.hbm %s1785_s3, 768 }
  0x48   : > { %p1098_p1 = scmp.ne.s32.totalorder %s1785_s3, %s1097_s29  ;;  %p1099_p0 = pneg %p1526_p11 }
  0x49   : > { %p1104_p10 = scmp.lt.u32.totalorder %s1097_s29, %s1785_s3 }
  0x4a   : > { %p1100_p2 = pnand %p1099_p0, %p1098_p1 }
  0x4c   : > { %p1101_p5 = pneg %p1100_p2 }
  0x4e   : > { %p1106_p13 = pnand %p1104_p10, %p1101_p5 }
  0x50   : > { %1109 = shalt.err (!%p1106_p13)
}
  0x51   : > { %s1110_s30 = scalar_lea.vmem %s1520_s9, 768  ;;  %p1118_p4 = scmp.lt.s32.totalorder %s1520_s9, %s1520_s9 }
  0x52   : > { %p1111_p3 = scmp.ne.s32.totalorder %s1520_s9, %s1110_s30  ;;  %p1119_p12 = scmp.lt.s32.totalorder %s1110_s30, %s1110_s30 }
  0x54   : > { %p1113_p8 = pnand %p1111_p3, %p1099_p0  ;;  %p1120_p7 = por %p1119_p12, %p1118_p4 }
  0x56   : > { %p1114_p6 = pneg %p1113_p8 }
  0x58   : > { %p1121_p9 = pnand %p1120_p7, %p1114_p6 }
  0x5a   : > { %1124 = shalt.err (!%p1121_p9)
}
  0x5b   : > { %s1339_s24 = smov 64   ;;  %s1340_s29 = smov 4  }
  0x5c   : > { %983 = dma.hbm_to_vmem [thread:$0]  (!%p1526_p11), %s1785_s3, 768, %s1520_s9, [#allocation9], %s1339_s24, %s1339_s24, %s1340_s29  }
  0x5d   : > { %s1832_s8 = sand.u32 1, %s1323_s26   ;;  %s1125_s16 = scalar_lea.hbm %s1534_s1, 64 }
  0x5e   : > { %s288_s10 = scalar_lea.sflag [#allocation3], %s1832_s8  ;;  %p1126_p7 = scmp.ne.s32.totalorder %s1534_s1, %s1125_s16 }
  0x5f   : > { %p1833_p9 = scmp.ne.s32.totalorder %s1823_s23, 0  ;;  %s1130_s6 = scalar_lea.hbm %s1782_s0, 128 }
  0x60   : > { %p1131_p6 = scmp.lt.u32.totalorder %s1534_s1, %s1782_s0  ;;  %p1132_p8 = scmp.lt.u32.totalorder %s1130_s6, %s1125_s16 }
  0x61   : > { %p1128_p3 = pnand %p1126_p7, %p1833_p9  ;;  %p1134_p1 = scmp.lt.u32.totalorder %s1125_s16, %s1534_s1 }
  0x62   : > { %p1133_p12 = por %p1132_p8, %p1131_p6 }
  0x63   : > { %p1129_p4 = pneg %p1128_p3 }
  0x64   : > { %p1135_p0 = por %p1134_p1, %p1133_p12 }
  0x66   : > { %p1136_p11 = pnand %p1135_p0, %p1129_p4 }
  0x68   : > { %1139 = shalt.err (!%p1136_p11)
}
  0x69   : > { %s1140_s9 = scalar_lea.vmem %s1537_s28, 64  ;;  %s1341_s7 = smov [#allocation2]  }
  0x6a   : > { %p1141_p2 = scmp.ne.s32.totalorder %s1537_s28, %s1140_s9  ;;  %s1145_s17 = sshll.u32 %s1341_s7, 4  ;;  %s1146_s17 = int_to_ptr.vmem [resolvable:$false] %s1145_s17 }
  0x6b   : > { %s1147_s5 = scalar_lea.vmem %s1146_s17, 128  ;;  %p1148_p13 = scmp.lt.s32.totalorder %s1537_s28, %s1146_s17 }
  0x6c   : > { %p1143_p5 = pnand %p1141_p2, %p1833_p9  ;;  %p1149_p7 = scmp.lt.s32.totalorder %s1147_s5, %s1140_s9 }
  0x6e   : > { %p1144_p10 = pneg %p1143_p5  ;;  %p1150_p3 = por %p1149_p7, %p1148_p13 }
  0x70   : > { %p1151_p6 = pnand %p1150_p3, %p1144_p10 }
  0x72   : > { %1154 = shalt.err (!%p1151_p6)
}
  0x73   : > { %p1834_p4 = scmp.ne.s32.totalorder %s1820_s13, 0  ;;  %s1587_s24 = scalar_lea.hbm %s1784_s2, %s1438_s12 }
  0x74   : > { %s329_s29 = scalar_lea.vmem [#allocation7], %s1435_s11  ;;  %s1155_s20 = scalar_lea.hbm %s1587_s24, 64 }
  0x75   : > { %987 = dma.hbm_to_vmem [thread:$0]  (!%p1834_p4), %s1534_s1, 64, %s1537_s28, %s288_s10  }
  0x76   : > { %s337_s14 = sshll.u32 %s329_s29, 4  ;;  %p1156_p8 = scmp.ne.s32.totalorder %s1587_s24, %s1155_s20  ;;  %s338_s14 = int_to_ptr.vmem [resolvable:$true] %s337_s14 }
  0x77   : > { %s1160_s1 = scalar_lea.hbm %s1784_s2, 128  ;;  %p1161_p0 = scmp.lt.u32.totalorder %s1587_s24, %s1784_s2 }
  0x78   : > { %p1158_p12 = pnand %p1156_p8, %p1833_p9  ;;  %p1162_p11 = scmp.lt.u32.totalorder %s1160_s1, %s1155_s20 }
  0x79   : > { %p1164_p5 = scmp.lt.u32.totalorder %s1155_s20, %s1587_s24 }
  0x7a   : > { %p1159_p1 = pneg %p1158_p12  ;;  %p1163_p2 = por %p1162_p11, %p1161_p0 }
  0x7c   : > { %p1165_p10 = por %p1164_p5, %p1163_p2 }
  0x7e   : > { %p1166_p13 = pnand %p1165_p10, %p1159_p1 }
  0x80   : > { %1169 = shalt.err (!%p1166_p13)
}
  0x81   : > { %s1170_s11 = scalar_lea.vmem %s338_s14, 64  ;;  %s1342_s12 = smov [#allocation7]  }
  0x82   : > { %p1171_p7 = scmp.ne.s32.totalorder %s338_s14, %s1170_s11  ;;  %s1175_s30 = sshll.u32 %s1342_s12, 4  ;;  %s1176_s30 = int_to_ptr.vmem [resolvable:$false] %s1175_s30 }
  0x83   : > { %s1177_s9 = scalar_lea.vmem %s1176_s30, 128  ;;  %p1178_p8 = scmp.lt.s32.totalorder %s338_s14, %s1176_s30 }
  0x84   : > { %p1173_p3 = pnand %p1171_p7, %p1833_p9  ;;  %p1179_p12 = scmp.lt.s32.totalorder %s1177_s9, %s1170_s11 }
  0x86   : > { %p1174_p6 = pneg %p1173_p3  ;;  %p1180_p4 = por %p1179_p12, %p1178_p8 }
  0x88   : > { %p1181_p0 = pnand %p1180_p4, %p1174_p6 }
  0x8a   : > { %1184 = shalt.err (!%p1181_p0)
}
  0x8b   : > { %p1835_p11 = scmp.ne.s32.totalorder %s1820_s13, 0  ;;  %p1836_p1 = scmp.ne.s32.totalorder %s1830_s15, 0 }
  0x8c   : > { %s1611_s23 = sand.u32 (!%p1836_p1), 1, %s1319_s25   ;;  %p1837_p9 = scmp.ne.s32.totalorder (!%p1836_p1), %s1824_s19, 0 }
  0x8d   : > { %993 = dma.hbm_to_vmem [thread:$0]  (!%p1835_p11), %s1587_s24, 64, %s338_s14, %s1457_s21  }
  0x8e   : > { %346 = sbr.rel (%p1836_p1) target bundleno = 443 (0x1bb), region = 40  ;;  %s1614_s7 = sshll.u32 (!%p1836_p1), %s1611_s23, 2 }
  0x8f   : > { %s349_s17 = scalar_lea.sflag (!%p1836_p1), [#allocation3], %s1611_s23  ;;  %s352_s5 = scalar_lea.vmem (!%p1836_p1), [#allocation2], %s1614_s7 }
  0x95   : > { %1294 = dma.done.wait (%p1837_p9), %s349_s17, 64  }
  0x96   : > { %1296 = vsyncadd (%p1837_p9), %s349_s17, 4294967232  ;;  %s357_s13 = sand.u32 1, %s1488_s22   ;;  %s361_s15 = scalar_lea.vmem [#allocation5], %s1614_s7 }
  0x97   : > { %s358_s21 = scalar_lea.sflag [#allocation6], %s357_s13 }
  0x98   : > { %1298 = dma.done.wait (%p1837_p9), %s358_s21, 128  }
  0x99   : > { %1300 = vsyncadd (%p1837_p9), %s358_s21, 4294967168  ;;  %s370_s6 = scalar_lea.vmem [#allocation7], %s1614_s7  ;;  %p1838_p4 = scmp.eq.s32.totalorder %s1488_s22, 0 }
  0x9b   : > { %1302 = dma.done.wait (%p1838_p4), [#allocation9], 768   ;;  %p1839_p2 = pmov %p1838_p4 }
  0x9c   : > { %v1343_v0 = vmov 0.0   ;;  %vm1344_vm0 = vmmov 0   ;;  %v1061_v1 = vld [vmem:[#allocation8] sm:$0xff]   ;;  %v1062_v2 = vld [vmem:[#allocation8 + $0x8] sm:$0xff]   ;;  %v1063_v3 = vld [vmem:[#allocation8 + $0x10] sm:$0xff]   ;;  %vm450_vm1 = vcmask 261120  }
  0x9d   : > { %1304 = vsyncadd (%p1839_p2), [#allocation9], 4294966528  ;;  %940 = vmatprep.subr.bf16.mxu0 %v1343_v0  ;;  %948 = vmatprep.subr.bf16.mxu1 %v1343_v0  ;;  %v1065_v4 = vld [vmem:[#allocation8 + $0x18] sm:$0xff]   ;;  %v426_v5 = vld [vmem:[%s352_s5] sm:$0xf]  ;;  %s1647_s14 = sshll.u32 %s1327_s27, 6 }
  0x9e   : > { %944 = vmatprep.mubr.msk.bf16.mxu0 %vm1344_vm0, %v1343_v0  ;;  %952 = vmatprep.mubr.msk.bf16.mxu1 %vm1344_vm0, %v1343_v0  ;;  %v1064_v6 = vld [vmem:[#allocation8 + $0x20] sm:$0xff]   ;;  %v497_v7 = vld [vmem:[%s361_s15] sm:$0xf]  ;;  %v1066_v8 = vld [vmem:[#allocation8 + $0x28] sm:$0xff]   ;;  %s410_s20 = scalar_lea.vmem [#allocation10], %s1614_s7  ;;  %vm495_vm2 = vcmask 257024  }
  0x9f   : > { %941 = vmatpush3.bf16.msra.mxu0 %v1061_v1  ;;  %949 = vmatpush3.bf16.msra.mxu1 %v1063_v3  ;;  %v568_v9 = vld [vmem:[%s370_s6] sm:$0xf]  ;;  %v909_v10 = vld [vmem:[%s1786_s4] ss:$0 sm:$0xff]  ;;  %v914_v12 = vld [vmem:[%s1786_s4 + $0x1] ss:$0 sm:$0xff] }
  0xa0   : > { %942 = vmatprep.subr.bf16.mxu0 %v1343_v0  ;;  %950 = vmatprep.subr.bf16.mxu1 %v1343_v0  ;;  %s664_s8 = sshll.u32 %s410_s20, 4  ;;  %s417_s16 = scalar_lea.vmem [#allocation11], %s1614_s7  ;;  %v919_v24 = vld [vmem:[%s1786_s4 + $0x2] ss:$0 sm:$0xff]  ;;  %s1659_s8 = int_to_ptr.vmem [resolvable:$true] %s664_s8 }
  0xa1   : > { %s678_s1 = sshll.u32 %s417_s16, 4  ;;  %s1840_s28 = sld [smem:[#allocation24_spill]]  ;;  %s1667_s1 = int_to_ptr.vmem [resolvable:$true] %s678_s1 }
  0xa2   : > { %s1841_s11 = sld [smem:[#allocation27_spill]]  ;;  %s1842_s17 = sld [smem:[#allocation28_spill]] }
  0xa3   : > { %943 = vmatpush3.bf16.msra.mxu0 %v1062_v2  ;;  %951 = vmatpush3.bf16.msra.mxu1 %v1065_v4  ;;  %s640_s6 = scalar_lea.sflag [#allocation4], %s1611_s23  ;;  %s1185_s19 = scalar_lea.vmem %s1659_s8, 64 }
  0xa4   : > { %956 = vmatprep.subr.bf16.mxu0 %v1343_v0  ;;  %p1186_p5 = scmp.ne.s32.totalorder %s1659_s8, %s1185_s19  ;;  %s1345_s18 = smov [#allocation10]  }
  0xa5   : > { %s1189_s24 = sshll.u32 %s1345_s18, 4  ;;  %s1190_s24 = int_to_ptr.vmem [resolvable:$false] %s1189_s24 }
  0xa6   : > { %945 = vmatmul.mubr.msk.bf16.vlgmr.msra.gmra.mrb[0].mxu0 %vm450_vm1, %v426_v5  ;;  %953 = vmatmul.mubr.msk.bf16.vlgmr.msra.gmra.mrb[0].mxu1 %vm450_vm1, %v497_v7  ;;  %s1191_s29 = scalar_lea.vmem %s1190_s24, 128  ;;  %p1192_p3 = scmp.lt.s32.totalorder %s1659_s8, %s1190_s24 }
  0xa7   : > { %957 = vmatpush3.bf16.msra.mxu0 %v1064_v6  ;;  %960 = vmatprep.mubr.msk.bf16.mxu0 %vm1344_vm0, %v1343_v0  ;;  %p1843_p10 = scmp.ne.s32.totalorder %s1840_s28, 0  ;;  %p1193_p6 = scmp.lt.s32.totalorder %s1191_s29, %s1185_s19 }
  0xa8   : > { %958 = vmatprep.subr.bf16.mxu0 %v1343_v0  ;;  %s1657_s12 = scalar_lea.hbm %s1841_s11, %s1647_s14  ;;  %s1665_s5 = scalar_lea.hbm %s1842_s17, %s1647_s14 }
  0xa9   : > { %p1187_p13 = pnand %p1186_p5, %p1843_p10  ;;  %p1194_p8 = por %p1193_p6, %p1192_p3 }
  0xab   : > { %959 = vmatpush3.bf16.msra.mxu0 %v1066_v8  ;;  %p1188_p7 = pneg %p1187_p13 }
  0xad   : > { %p1195_p12 = pnand %p1194_p8, %p1188_p7 }
  0xae   : > { %961 = vmatmul.mubr.msk.bf16.vlgmr.msra.gmra.mrb[4].mxu0 %vm450_vm1, %v568_v9 }
 0x179   : > { %v488_v11 = vpop.f32.mrb[0].mxu0  ;;  %v560_v16 = vpop.f32.mrb[0].mxu1 }
 0x17a   : > { %v489_v13 = vadd.f32 %v909_v10, %v488_v11  ;;  %v946_v14 = vpop.f32.mrb[1].mxu0  ;;  %v561_v19 = vadd.f32 %v914_v12, %v560_v16  ;;  %v954_v20 = vpop.f32.mrb[1].mxu1 }
 0x17b   : > { %v491_v15 = vpop.f32.mrb[2].mxu0  ;;  %v563_v21 = vpop.f32.mrb[2].mxu1 }
 0x17c   : > { %v494_v17 = vpack.c.bf16 %v489_v13, %v489_v13  ;;  %v947_v18 = vpop.f32.mrb[3].mxu0  ;;  %v566_v22 = vpack.c.bf16 %v561_v19, %v561_v19  ;;  %v955_v23 = vpop.f32.mrb[3].mxu1 }
 0x17e   : > { %496 = vst.msk [vmem:[%s410_s20] sm:$0xf] %vm495_vm2, %v494_v17 }
 0x17f   : > { %1198 = shalt.err (!%p1195_p12)
}
 0x180   : > { %s1199_s23 = scalar_lea.hbm %s1657_s12, 64  ;;  %s1203_s10 = scalar_lea.hbm %s1841_s11, 128 }
 0x181   : > { %p1200_p0 = scmp.ne.s32.totalorder %s1657_s12, %s1199_s23  ;;  %p1204_p9 = scmp.lt.u32.totalorder %s1657_s12, %s1841_s11 }
 0x182   : > { %p1205_p4 = scmp.lt.u32.totalorder %s1203_s10, %s1199_s23  ;;  %p1207_p5 = scmp.lt.u32.totalorder %s1199_s23, %s1657_s12 }
 0x183   : > { %p1201_p11 = pnand %p1200_p0, %p1843_p10 }
 0x184   : > { %p1206_p2 = por %p1205_p4, %p1204_p9 }
 0x185   : > { %p1202_p1 = pneg %p1201_p11 }
 0x186   : > { %p1208_p13 = por %p1207_p5, %p1206_p2 }
 0x188   : > { %p1209_p7 = pnand %p1208_p13, %p1202_p1 }
 0x18a   : > { %1212 = shalt.err (!%p1209_p7)
}
 0x18b   : > { %974 = dma.vmem_to_hbm [thread:$0]  (%p1843_p10), %s1659_s8, 64, %s1657_s12, %s640_s6   ;;  %567 = vst.msk [vmem:[%s417_s16] sm:$0xf] %vm495_vm2, %v566_v22  ;;  %v631_v25 = vpop.f32.mrb[4].mxu0 }
 0x18c   : > { %s424_s21 = scalar_lea.vmem [#allocation13], %s1614_s7  ;;  %s1705_s19 = scalar_lea.sflag [#allocation12], %s357_s13 }
 0x18d   : > { %s1701_s15 = sshll.u32 %s424_s21, 4  ;;  %s1213_s18 = scalar_lea.vmem %s1667_s1, 64  ;;  %s693_s15 = int_to_ptr.vmem [resolvable:$true] %s1701_s15 }
 0x18e   : > { %p1214_p3 = scmp.ne.s32.totalorder %s1667_s1, %s1213_s18  ;;  %s1346_s24 = smov [#allocation11]  }
 0x18f   : > { %s1217_s29 = sshll.u32 %s1346_s24, 4  ;;  %s1218_s29 = int_to_ptr.vmem [resolvable:$false] %s1217_s29 }
 0x190   : > { %p1215_p6 = pnand %p1214_p3, %p1843_p10  ;;  %s1219_s8 = scalar_lea.vmem %s1218_s29, 128 }
 0x191   : > { %p1220_p12 = scmp.lt.s32.totalorder %s1667_s1, %s1218_s29  ;;  %p1221_p0 = scmp.lt.s32.totalorder %s1219_s8, %s1213_s18 }
 0x192   : > { %p1216_p8 = pneg %p1215_p6 }
 0x193   : > { %p1222_p11 = por %p1221_p0, %p1220_p12 }
 0x195   : > { %p1223_p1 = pnand %p1222_p11, %p1216_p8 }
 0x197   : > { %1226 = shalt.err (!%p1223_p1)
}
 0x198   : > { %s1227_s22 = scalar_lea.hbm %s1665_s5, 64  ;;  %s1231_s12 = scalar_lea.hbm %s1842_s17, 128 }
 0x199   : > { %p1228_p9 = scmp.ne.s32.totalorder %s1665_s5, %s1227_s22  ;;  %p1232_p5 = scmp.lt.u32.totalorder %s1665_s5, %s1842_s17 }
 0x19a   : > { %p1233_p13 = scmp.lt.u32.totalorder %s1231_s12, %s1227_s22  ;;  %p1235_p3 = scmp.lt.u32.totalorder %s1227_s22, %s1665_s5 }
 0x19b   : > { %p1229_p4 = pnand %p1228_p9, %p1843_p10 }
 0x19c   : > { %p1234_p7 = por %p1233_p13, %p1232_p5 }
 0x19d   : > { %p1230_p2 = pneg %p1229_p4 }
 0x19e   : > { %p1236_p6 = por %p1235_p3, %p1234_p7 }
 0x1a0   : > { %p1237_p8 = pnand %p1236_p6, %p1230_p2 }
 0x1a2   : > { %1240 = shalt.err (!%p1237_p8)
}
 0x1a3   : > { %975 = dma.vmem_to_hbm [thread:$0]  (%p1843_p10), %s1667_s1, 64, %s1665_s5, %s1705_s19   ;;  %v632_v26 = vadd.f32 %v919_v24, %v631_v25  ;;  %v962_v27 = vpop.f32.mrb[5].mxu0 }
 0x1a4   : > { %v634_v28 = vpop.f32.mrb[6].mxu0  ;;  %s1844_s10 = sld [smem:[#allocation29_spill]]  ;;  %s1241_s9 = scalar_lea.vmem %s693_s15, 64 }
 0x1a5   : > { %v637_v29 = vpack.c.bf16 %v632_v26, %v632_v26  ;;  %v963_v30 = vpop.f32.mrb[7].mxu0  ;;  %p1242_p12 = scmp.ne.s32.totalorder %s693_s15, %s1241_s9  ;;  %s1347_s1 = smov [#allocation13]  }
 0x1a6   : > { %s1245_s5 = sshll.u32 %s1347_s1, 4  ;;  %s1246_s5 = int_to_ptr.vmem [resolvable:$false] %s1245_s5 }
 0x1a7   : > { %638 = vst.msk [vmem:[%s424_s21] sm:$0xf] %vm495_vm2, %v637_v29  ;;  %p1243_p0 = pnand %p1242_p12, %p1843_p10  ;;  %s1247_s18 = scalar_lea.vmem %s1246_s5, 128 }
 0x1a8   : > { %p1248_p1 = scmp.lt.s32.totalorder %s693_s15, %s1246_s5  ;;  %p1249_p9 = scmp.lt.s32.totalorder %s1247_s18, %s1241_s9 }
 0x1a9   : > { %p1244_p11 = pneg %p1243_p0 }
 0x1aa   : > { %s1733_s30 = scalar_lea.hbm %s1844_s10, %s1647_s14  ;;  %p1250_p4 = por %p1249_p9, %p1248_p1 }
 0x1ac   : > { %p1251_p2 = pnand %p1250_p4, %p1244_p11 }
 0x1ae   : > { %1254 = shalt.err (!%p1251_p2)
}
 0x1af   : > { %s1255_s7 = scalar_lea.hbm %s1733_s30, 64  ;;  %s1259_s24 = scalar_lea.hbm %s1844_s10, 128 }
 0x1b0   : > { %p1256_p5 = scmp.ne.s32.totalorder %s1733_s30, %s1255_s7  ;;  %p1260_p3 = scmp.lt.u32.totalorder %s1733_s30, %s1844_s10 }
 0x1b1   : > { %p1261_p6 = scmp.lt.u32.totalorder %s1259_s24, %s1255_s7  ;;  %p1263_p12 = scmp.lt.u32.totalorder %s1255_s7, %s1733_s30 }
 0x1b2   : > { %p1257_p13 = pnand %p1256_p5, %p1843_p10 }
 0x1b3   : > { %p1262_p8 = por %p1261_p6, %p1260_p3 }
 0x1b4   : > { %p1258_p7 = pneg %p1257_p13 }
 0x1b5   : > { %p1264_p0 = por %p1263_p12, %p1262_p8 }
 0x1b7   : > { %p1265_p11 = pnand %p1264_p0, %p1258_p7 }
 0x1b9   : > { %1268 = shalt.err (!%p1265_p11)
}
 0x1ba   : > { %976 = dma.vmem_to_hbm [thread:$0]  (%p1843_p10), %s693_s15, 64, %s1733_s30, %s1705_s19  }
 0x1bb PF: > { %s1845_s22 = sld [smem:[#allocation19_spill]]  ;;  %s1846_s13 = sld [smem:[#allocation25_spill]] }
 0x1bc   : > { %s1847_s16 = sld [smem:[#allocation21_spill]] }
 0x1c1   : > { %s704_s12 = sand.u32 1, %s1845_s22   ;;  %p1848_p1 = scmp.ne.s32.totalorder %s1846_s13, 0 }
 0x1c2   : > { %p1849_p9 = scmp.ge.s32.totalorder %s1847_s16, 2  ;;  %s705_s6 = scalar_lea.sflag [#allocation4], %s704_s12 }
 0x1c4   : > { %p995_p4 = pnand %p1849_p9, %p1848_p1 }
 0x1c6   : > { %1306 = dma.done.wait (!%p995_p4), %s705_s6, 64  }
 0x1c7   : > { %1308 = vsyncadd (!%p995_p4), %s705_s6, 4294967232  ;;  %s1850_s23 = sadd.s32 4294967294, %s1847_s16  }
 0x1c8   : > { %s713_s20 = sand.u32 1, %s1850_s23  }
 0x1c9   : > { %s714_s27 = scalar_lea.sflag [#allocation12], %s713_s20 }
 0x1ca   : > { %1310 = dma.done.wait (!%p995_p4), %s714_s27, 128  }
 0x1cb   : > { %1312 = vsyncadd (!%p995_p4), %s714_s27, 4294967168  ;;  %s31_s29 = sadd.s32 1, %s1847_s16   ;;  %s1851_s28 = sld [smem:[#allocation23_spill]] }
 0x1cc   : > { %p28_p10 = scmp.ge.s32.totalorder %s31_s29, 4   ;;  %s1852_s27 = sld [smem:[#allocation20_spill]] }
 0x1cd   : > { %s1853_s15 = sld [smem:[#allocation22_spill]]  ;;  %s1854_s24 = smov %s1319_s25 }
 0x1ce   : > { %s1855_s25 = smov %s1323_s26  ;;  %30 = sbr.rel (!%p28_p10) target bundleno = 16 (0x10), region = 149 }
 0x1d1   : > { %s1856_s26 = smov %s1851_s28 }
 0x1d3   : > { %s1857_s28 = smov %s1853_s15 }
 0x1d5   :  { %728 = vsyncpa [#allocation3], 1 }
 0x1d6   :  { %730 = vsyncpa [#allocation3 + $0x1], 1 }
 0x1d7   :  { %731 = vsyncpa [#allocation6], 1 }
 0x1d8   :  { %733 = vsyncpa [#allocation6 + $0x1], 1 }
 0x1d9   :  { %734 = vsyncpa [#allocation9], 1 }
 0x1da   :  { %735 = vsyncpa [#allocation4], 1 }
 0x1db   :  { %737 = vsyncpa [#allocation4 + $0x1], 1 }
 0x1dc   :  { %738 = vsyncpa [#allocation12], 1 }
 0x1dd   :  { %740 = vsyncpa [#allocation12 + $0x1], 1 }

</bundles_post_ra>
